<compile_context>
chip_gen: v6e
topology: v6e:2x2x1
jax: 0.10.0
libtpu: 0.0.40
codegen_flags: <defaults>
</compile_context>

<pallas_src>
import functools

import jax
import jax.numpy as jnp
import numpy as np
from jax import lax
from jax.experimental import pallas as pl
from jax.experimental.pallas import tpu as pltpu

BN_EPS = 1e-5


def tcn_fused_kernel(*refs, B, L0, K, dilations, chans):
    """All TCN layers fused.

    refs layout:
      refs[0]                      : x (Cin0, B*L0)
      refs[1 : 1+7*L]              : per layer: w2d (Cout,K*Cin), b (Cout,1),
                                     gamma (Cout,1), beta (Cout,1),
                                     alpha (1,) in SMEM, w1 (Cout,Cout), b1 (Cout,1)
      refs[1+7*L]                  : out (Cout_f, B*Lf)
      refs[2+7*L]                  : im2col VMEM scratch (K*Cmax, B*Lf)
    """
    num_layers = len(dilations)
    x_ref = refs[0]
    params = refs[1:1 + 7 * num_layers]
    out_ref = refs[1 + 7 * num_layers]
    im_ref = refs[2 + 7 * num_layers]

    act = x_ref[...]                       # (Cin0, B*L0), fp32, column = b*L + l
    Lcur = L0

    for i in range(num_layers):            # static unroll (num_layers is small)
        (w2d_ref, b_ref, g_ref, be_ref, alpha_ref, w1_ref, b1_ref) = params[7 * i:7 * i + 7]
        Cin, Cout = chans[i]
        d = dilations[i]
        pad = (K - 1) * d
        Lout = Lcur + pad                  # Conv1d with padding=(K-1)*d grows L
        KC = K * Cin
        ncols = B * Lout

        # --- build im2col slab: row (t*Cin+c), col (b*Lout+l) = x[c, b, l+t*d-pad]
        # zero margins implement the conv's zero padding.
        im_ref[...] = jnp.zeros_like(im_ref)
        for t in range(K):
            l_lo = pad - t * d             # first output column this tap touches
            for b in range(B):
                im_ref[t * Cin:(t + 1) * Cin,
                       b * Lout + l_lo: b * Lout + l_lo + Lcur] = \
                    act[:, b * Lcur:(b + 1) * Lcur]
        xim = im_ref[0:KC, 0:ncols]        # (K*Cin, B*Lout)

        # --- dilated Conv1d: one MXU matmul (default precision, fp32 accum)
        y = jnp.dot(w2d_ref[...], xim, preferred_element_type=jnp.float32)
        y = y + b_ref[...]                 # (Cout, B*Lout)

        # --- BatchNorm1d (training mode: biased batch stats over (B, L)),
        #     single fused sweep for sum and sum-of-squares.
        inv_n = 1.0 / float(ncols)
        s1 = jnp.sum(y, axis=1, keepdims=True)
        s2 = jnp.sum(y * y, axis=1, keepdims=True)
        mean = s1 * inv_n
        var = s2 * inv_n - mean * mean
        scale = g_ref[...] * lax.rsqrt(var + BN_EPS)
        y = (y - mean) * scale + be_ref[...]

        # --- PReLU (single shared parameter, scalar from SMEM)
        a = alpha_ref[0]
        y = jnp.where(y >= 0.0, y, a * y)

        # --- 1x1 Conv1d: one MXU matmul
        act = jnp.dot(w1_ref[...], y, preferred_element_type=jnp.float32) + b1_ref[...]
        Lcur = Lout

    out_ref[...] = act.astype(out_ref.dtype)


@functools.partial(jax.jit, static_argnames=("kernel_size", "dilation_base"))
def tcn_block_forward(x, layer_params, kernel_size=3, dilation_base=2):
    B, Cin0, L0 = x.shape
    K = kernel_size
    num_layers = len(layer_params)
    dilations = tuple(dilation_base ** i for i in range(num_layers))

    vmem = pl.BlockSpec(memory_space=pltpu.MemorySpace.VMEM)
    smem = pl.BlockSpec(memory_space=pltpu.MemorySpace.SMEM)

    # input as a lane-dense (Cin, B*L) slab
    x2d = jnp.transpose(x, (1, 0, 2)).reshape(Cin0, B * L0)
    flat_inputs = [x2d]
    in_specs = [vmem]

    chans = []
    Lcur, Cin = L0, Cin0
    for i, (w, b, gamma, beta, alpha, w1, b1) in enumerate(layer_params):
        K_, Cout, Cin_w = w.shape
        assert K_ == K and Cin_w == Cin
        # w[t, o, c] -> w2d[o, t*Cin + c]
        w2d = jnp.transpose(w, (1, 0, 2)).reshape(Cout, K * Cin)
        flat_inputs += [w2d,
                        b.reshape(Cout, 1), gamma.reshape(Cout, 1), beta.reshape(Cout, 1),
                        alpha.reshape(1), w1, b1.reshape(Cout, 1)]
        in_specs += [vmem, vmem, vmem, vmem, smem, vmem, vmem]
        chans.append((Cin, Cout))
        Lcur = Lcur + (K - 1) * dilations[i]
        Cin = Cout

    Lf = Lcur
    Cout_f = chans[-1][1]
    KCmax = K * max(c[0] for c in chans)

    kernel = functools.partial(tcn_fused_kernel, B=B, L0=L0, K=K,
                               dilations=dilations, chans=tuple(chans))

    out2d = pl.pallas_call(
        kernel,
        out_shape=jax.ShapeDtypeStruct((Cout_f, B * Lf), jnp.float32),
        in_specs=in_specs,
        out_specs=pl.BlockSpec(memory_space=pltpu.MemorySpace.VMEM),
        scratch_shapes=[pltpu.VMEM((KCmax, B * Lf), jnp.float32)],
    )(*flat_inputs)

    return out2d.reshape(Cout_f, B, Lf).transpose(1, 0, 2)


def init_params(key, in_channels, out_channels, num_layers, kernel_size):
    # Mirrors the module: every dilated conv is Conv1d(in_channels, out_channels, ...),
    # so (as in the PyTorch code) num_layers > 1 requires in_channels == out_channels.
    params = []
    for _ in range(num_layers):
        key, k0, k1, k2, k3, k4, k5 = jax.random.split(key, 7)
        w = 0.1 * jax.random.normal(k0, (kernel_size, out_channels, in_channels), jnp.float32)
        b = 0.1 * jax.random.normal(k1, (out_channels,), jnp.float32)
        gamma = 1.0 + 0.1 * jax.random.normal(k2, (out_channels,), jnp.float32)
        beta = 0.1 * jax.random.normal(k3, (out_channels,), jnp.float32)
        alpha = jnp.full((), 0.25, jnp.float32)          # PReLU default init
        w1 = 0.1 * jax.random.normal(k4, (out_channels, out_channels), jnp.float32)
        b1 = 0.1 * jax.random.normal(k5, (out_channels,), jnp.float32)
        params.append((w, b, gamma, beta, alpha, w1, b1))
    return params


def reference_forward(x, layer_params, kernel_size=3, dilation_base=2):
    """Pure-JAX fp32 reference with lax.conv_general_dilated (PyTorch semantics)."""
    dn = ('NCH', 'OIH', 'NCH')
    for i, (w, b, gamma, beta, alpha, w1, b1) in enumerate(layer_params):
        d = dilation_base ** i
        pad = (kernel_size - 1) * d
        w_oik = jnp.transpose(w, (1, 2, 0))              # (Cout, Cin, K)
        y = lax.conv_general_dilated(x, w_oik, (1,), [(pad, pad)],
                                     rhs_dilation=(d,), dimension_numbers=dn,
                                     precision=jax.lax.Precision.HIGHEST)
        y = y + b[None, :, None]
        mean = jnp.mean(y, axis=(0, 2), keepdims=True)
        var = jnp.mean((y - mean) ** 2, axis=(0, 2), keepdims=True)
        y = gamma[None, :, None] * (y - mean) / jnp.sqrt(var + BN_EPS) + beta[None, :, None]
        y = jnp.where(y >= 0, y, alpha * y)
        x = lax.conv_general_dilated(y, w1[:, :, None], (1,), [(0, 0)],
                                     dimension_numbers=dn,
                                     precision=jax.lax.Precision.HIGHEST)
        x = x + b1[None, :, None]
    return x


if __name__ == "__main__":
    B, C, L = 2, 8, 32          # batch, channels (in == out), time
    num_layers, K, base = 2, 3, 2

    key = jax.random.PRNGKey(0)
    kx, kp = jax.random.split(key)
    x = jax.random.normal(kx, (B, C, L), dtype=jnp.float32)
    params = init_params(kp, C, C, num_layers, K)

    out = tcn_block_forward(x, params, kernel_size=K, dilation_base=base)
    out = jax.block_until_ready(out)

    ref = reference_forward(x, params, kernel_size=K, dilation_base=base)
    # Kernel matmuls use default (bf16-operand) MXU precision; reference is fp32.
    np.testing.assert_allclose(np.asarray(out), np.asarray(ref), rtol=2e-2, atol=2e-2)

    print("KERNEL_OK")
</pallas_src>

<mosaic_0001>
module attributes {stable_mosaic.version = 11 : i64} {
  func.func @tcn_fused_kernel(%arg0: memref<8x64xf32, #tpu.memory_space<vmem>>, %arg1: memref<8x24xf32, #tpu.memory_space<vmem>>, %arg2: memref<8x1xf32, #tpu.memory_space<vmem>>, %arg3: memref<8x1xf32, #tpu.memory_space<vmem>>, %arg4: memref<8x1xf32, #tpu.memory_space<vmem>>, %arg5: memref<1xf32, #tpu.memory_space<smem>>, %arg6: memref<8x8xf32, #tpu.memory_space<vmem>>, %arg7: memref<8x1xf32, #tpu.memory_space<vmem>>, %arg8: memref<8x24xf32, #tpu.memory_space<vmem>>, %arg9: memref<8x1xf32, #tpu.memory_space<vmem>>, %arg10: memref<8x1xf32, #tpu.memory_space<vmem>>, %arg11: memref<8x1xf32, #tpu.memory_space<vmem>>, %arg12: memref<1xf32, #tpu.memory_space<smem>>, %arg13: memref<8x8xf32, #tpu.memory_space<vmem>>, %arg14: memref<8x1xf32, #tpu.memory_space<vmem>>, %arg15: memref<8x76xf32, #tpu.memory_space<vmem>>, %arg16: memref<24x76xf32, #tpu.memory_space<vmem>>) attributes {dimension_semantics = [], scalar_prefetch = 0 : i64, scratch_operands = 1 : i64, tpu.core_type = #tpu.core_type<tc>} {
    %c0 = arith.constant 0 : index
    %c0_0 = arith.constant 0 : index
    %0 = vector.load %arg0[%c0, %c0_0] : memref<8x64xf32, #tpu.memory_space<vmem>>, vector<8x64xf32>
    %cst = arith.constant 0.000000e+00 : f32
    %1 = vector.broadcast %cst : f32 to vector<24x76xf32>
    %c0_1 = arith.constant 0 : index
    %c0_2 = arith.constant 0 : index
    %2 = vector.load %arg16[%c0_1, %c0_2] : memref<24x76xf32, #tpu.memory_space<vmem>>, vector<24x76xf32>
    tpu.vector_store %arg16[%c0_1, %c0_2], %1 {strides = array<i32>} : memref<24x76xf32, #tpu.memory_space<vmem>>, vector<24x76xf32>,
    %3 = vector.extract_strided_slice %0 {offsets = [0, 0], sizes = [8, 32], strides = [1, 1]} : vector<8x64xf32> to vector<8x32xf32>
    %c0_3 = arith.constant 0 : index
    %c2 = arith.constant 2 : index
    %4 = vector.load %arg16[%c0_3, %c2] : memref<24x76xf32, #tpu.memory_space<vmem>>, vector<8x32xf32>
    tpu.vector_store %arg16[%c0_3, %c2], %3 {strides = array<i32>} : memref<24x76xf32, #tpu.memory_space<vmem>>, vector<8x32xf32>,
    %5 = vector.extract_strided_slice %0 {offsets = [0, 32], sizes = [8, 32], strides = [1, 1]} : vector<8x64xf32> to vector<8x32xf32>
    %c0_4 = arith.constant 0 : index
    %c36 = arith.constant 36 : index
    %6 = vector.load %arg16[%c0_4, %c36] : memref<24x76xf32, #tpu.memory_space<vmem>>, vector<8x32xf32>
    tpu.vector_store %arg16[%c0_4, %c36], %5 {strides = array<i32>} : memref<24x76xf32, #tpu.memory_space<vmem>>, vector<8x32xf32>,
    %7 = vector.extract_strided_slice %0 {offsets = [0, 0], sizes = [8, 32], strides = [1, 1]} : vector<8x64xf32> to vector<8x32xf32>
    %c8 = arith.constant 8 : index
    %c1 = arith.constant 1 : index
    %8 = vector.load %arg16[%c8, %c1] : memref<24x76xf32, #tpu.memory_space<vmem>>, vector<8x32xf32>
    tpu.vector_store %arg16[%c8, %c1], %7 {strides = array<i32>} : memref<24x76xf32, #tpu.memory_space<vmem>>, vector<8x32xf32>,
    %9 = vector.extract_strided_slice %0 {offsets = [0, 32], sizes = [8, 32], strides = [1, 1]} : vector<8x64xf32> to vector<8x32xf32>
    %c8_5 = arith.constant 8 : index
    %c35 = arith.constant 35 : index
    %10 = vector.load %arg16[%c8_5, %c35] : memref<24x76xf32, #tpu.memory_space<vmem>>, vector<8x32xf32>
    tpu.vector_store %arg16[%c8_5, %c35], %9 {strides = array<i32>} : memref<24x76xf32, #tpu.memory_space<vmem>>, vector<8x32xf32>,
    %11 = vector.extract_strided_slice %0 {offsets = [0, 0], sizes = [8, 32], strides = [1, 1]} : vector<8x64xf32> to vector<8x32xf32>
    %c16 = arith.constant 16 : index
    %c0_6 = arith.constant 0 : index
    %12 = vector.load %arg16[%c16, %c0_6] : memref<24x76xf32, #tpu.memory_space<vmem>>, vector<8x32xf32>
    tpu.vector_store %arg16[%c16, %c0_6], %11 {strides = array<i32>} : memref<24x76xf32, #tpu.memory_space<vmem>>, vector<8x32xf32>,
    %13 = vector.extract_strided_slice %0 {offsets = [0, 32], sizes = [8, 32], strides = [1, 1]} : vector<8x64xf32> to vector<8x32xf32>
    %c16_7 = arith.constant 16 : index
    %c34 = arith.constant 34 : index
    %14 = vector.load %arg16[%c16_7, %c34] : memref<24x76xf32, #tpu.memory_space<vmem>>, vector<8x32xf32>
    tpu.vector_store %arg16[%c16_7, %c34], %13 {strides = array<i32>} : memref<24x76xf32, #tpu.memory_space<vmem>>, vector<8x32xf32>,
    %c0_8 = arith.constant 0 : index
    %c0_9 = arith.constant 0 : index
    %15 = vector.load %arg16[%c0_8, %c0_9] : memref<24x76xf32, #tpu.memory_space<vmem>>, vector<24x68xf32>
    %c0_10 = arith.constant 0 : index
    %c0_11 = arith.constant 0 : index
    %16 = vector.load %arg1[%c0_10, %c0_11] : memref<8x24xf32, #tpu.memory_space<vmem>>, vector<8x24xf32>
    %cst_12 = arith.constant dense<0.000000e+00> : vector<8x68xf32>
    %17 = tpu.matmul %16, %15, %cst_12 {dimension_numbers = #tpu.dot_dimension_numbers<[1], [0], [0], [1], [0, 0, 1, 1], [], []>} : vector<8x24xf32>, vector<24x68xf32>, vector<8x68xf32> -> vector<8x68xf32>
    %c0_13 = arith.constant 0 : index
    %c0_14 = arith.constant 0 : index
    %18 = vector.load %arg2[%c0_13, %c0_14] : memref<8x1xf32, #tpu.memory_space<vmem>>, vector<8x1xf32>
    %19 = vector.broadcast %18 : vector<8x1xf32> to vector<8x68xf32>
    %20 = arith.addf %17, %19 : vector<8x68xf32>
    %cst_15 = arith.constant dense<0.000000e+00> : vector<8xf32>
    %21 = vector.multi_reduction <add>, %20, %cst_15 [1] : vector<8x68xf32> to vector<8xf32>
    %22 = vector.shape_cast %21 : vector<8xf32> to vector<8x1xf32>
    %23 = arith.mulf %20, %20 : vector<8x68xf32>
    %cst_16 = arith.constant dense<0.000000e+00> : vector<8xf32>
    %24 = vector.multi_reduction <add>, %23, %cst_16 [1] : vector<8x68xf32> to vector<8xf32>
    %25 = vector.shape_cast %24 : vector<8xf32> to vector<8x1xf32>
    %cst_17 = arith.constant 0.0147058824 : f32
    %26 = vector.broadcast %cst_17 : f32 to vector<8x1xf32>
    %27 = arith.mulf %22, %26 : vector<8x1xf32>
    %cst_18 = arith.constant 0.0147058824 : f32
    %28 = vector.broadcast %cst_18 : f32 to vector<8x1xf32>
    %29 = arith.mulf %25, %28 : vector<8x1xf32>
    %30 = arith.mulf %27, %27 : vector<8x1xf32>
    %31 = arith.subf %29, %30 : vector<8x1xf32>
    %c0_19 = arith.constant 0 : index
    %c0_20 = arith.constant 0 : index
    %32 = vector.load %arg3[%c0_19, %c0_20] : memref<8x1xf32, #tpu.memory_space<vmem>>, vector<8x1xf32>
    %cst_21 = arith.constant 9.99999974E-6 : f32
    %33 = vector.broadcast %cst_21 : f32 to vector<8x1xf32>
    %34 = arith.addf %31, %33 : vector<8x1xf32>
    %35 = math.rsqrt %34 : vector<8x1xf32>
    %36 = arith.mulf %32, %35 : vector<8x1xf32>
    %37 = vector.broadcast %27 : vector<8x1xf32> to vector<8x68xf32>
    %38 = arith.subf %20, %37 : vector<8x68xf32>
    %39 = vector.broadcast %36 : vector<8x1xf32> to vector<8x68xf32>
    %40 = arith.mulf %38, %39 : vector<8x68xf32>
    %c0_22 = arith.constant 0 : index
    %c0_23 = arith.constant 0 : index
    %41 = vector.load %arg4[%c0_22, %c0_23] : memref<8x1xf32, #tpu.memory_space<vmem>>, vector<8x1xf32>
    %42 = vector.broadcast %41 : vector<8x1xf32> to vector<8x68xf32>
    %43 = arith.addf %40, %42 : vector<8x68xf32>
    %c0_24 = arith.constant 0 : index
    %44 = memref.load %arg5[%c0_24] : memref<1xf32, #tpu.memory_space<smem>>
    %cst_25 = arith.constant 0.000000e+00 : f32
    %45 = vector.broadcast %cst_25 : f32 to vector<8x68xf32>
    %46 = arith.cmpf oge, %43, %45 : vector<8x68xf32>
    %47 = vector.broadcast %44 : f32 to vector<8x68xf32>
    %48 = arith.mulf %47, %43 : vector<8x68xf32>
    %49 = arith.select %46, %43, %48 : vector<8x68xi1>, vector<8x68xf32>
    %c0_26 = arith.constant 0 : index
    %c0_27 = arith.constant 0 : index
    %50 = vector.load %arg6[%c0_26, %c0_27] : memref<8x8xf32, #tpu.memory_space<vmem>>, vector<8x8xf32>
    %cst_28 = arith.constant dense<0.000000e+00> : vector<8x68xf32>
    %51 = tpu.matmul %50, %49, %cst_28 {dimension_numbers = #tpu.dot_dimension_numbers<[1], [0], [0], [1], [0, 0, 1, 1], [], []>} : vector<8x8xf32>, vector<8x68xf32>, vector<8x68xf32> -> vector<8x68xf32>
    %c0_29 = arith.constant 0 : index
    %c0_30 = arith.constant 0 : index
    %52 = vector.load %arg7[%c0_29, %c0_30] : memref<8x1xf32, #tpu.memory_space<vmem>>, vector<8x1xf32>
    %53 = vector.broadcast %52 : vector<8x1xf32> to vector<8x68xf32>
    %54 = arith.addf %51, %53 : vector<8x68xf32>
    %cst_31 = arith.constant 0.000000e+00 : f32
    %55 = vector.broadcast %cst_31 : f32 to vector<24x76xf32>
    %c0_32 = arith.constant 0 : index
    %c0_33 = arith.constant 0 : index
    %56 = vector.load %arg16[%c0_32, %c0_33] : memref<24x76xf32, #tpu.memory_space<vmem>>, vector<24x76xf32>
    tpu.vector_store %arg16[%c0_32, %c0_33], %55 {strides = array<i32>} : memref<24x76xf32, #tpu.memory_space<vmem>>, vector<24x76xf32>,
    %57 = vector.extract_strided_slice %54 {offsets = [0, 0], sizes = [8, 34], strides = [1, 1]} : vector<8x68xf32> to vector<8x34xf32>
    %c0_34 = arith.constant 0 : index
    %c4 = arith.constant 4 : index
    %58 = vector.load %arg16[%c0_34, %c4] : memref<24x76xf32, #tpu.memory_space<vmem>>, vector<8x34xf32>
    tpu.vector_store %arg16[%c0_34, %c4], %57 {strides = array<i32>} : memref<24x76xf32, #tpu.memory_space<vmem>>, vector<8x34xf32>,
    %59 = vector.extract_strided_slice %54 {offsets = [0, 34], sizes = [8, 34], strides = [1, 1]} : vector<8x68xf32> to vector<8x34xf32>
    %c0_35 = arith.constant 0 : index
    %c42 = arith.constant 42 : index
    %60 = vector.load %arg16[%c0_35, %c42] : memref<24x76xf32, #tpu.memory_space<vmem>>, vector<8x34xf32>
    tpu.vector_store %arg16[%c0_35, %c42], %59 {strides = array<i32>} : memref<24x76xf32, #tpu.memory_space<vmem>>, vector<8x34xf32>,
    %61 = vector.extract_strided_slice %54 {offsets = [0, 0], sizes = [8, 34], strides = [1, 1]} : vector<8x68xf32> to vector<8x34xf32>
    %c8_36 = arith.constant 8 : index
    %c2_37 = arith.constant 2 : index
    %62 = vector.load %arg16[%c8_36, %c2_37] : memref<24x76xf32, #tpu.memory_space<vmem>>, vector<8x34xf32>
    tpu.vector_store %arg16[%c8_36, %c2_37], %61 {strides = array<i32>} : memref<24x76xf32, #tpu.memory_space<vmem>>, vector<8x34xf32>,
    %63 = vector.extract_strided_slice %54 {offsets = [0, 34], sizes = [8, 34], strides = [1, 1]} : vector<8x68xf32> to vector<8x34xf32>
    %c8_38 = arith.constant 8 : index
    %c40 = arith.constant 40 : index
    %64 = vector.load %arg16[%c8_38, %c40] : memref<24x76xf32, #tpu.memory_space<vmem>>, vector<8x34xf32>
    tpu.vector_store %arg16[%c8_38, %c40], %63 {strides = array<i32>} : memref<24x76xf32, #tpu.memory_space<vmem>>, vector<8x34xf32>,
    %65 = vector.extract_strided_slice %54 {offsets = [0, 0], sizes = [8, 34], strides = [1, 1]} : vector<8x68xf32> to vector<8x34xf32>
    %c16_39 = arith.constant 16 : index
    %c0_40 = arith.constant 0 : index
    %66 = vector.load %arg16[%c16_39, %c0_40] : memref<24x76xf32, #tpu.memory_space<vmem>>, vector<8x34xf32>
    tpu.vector_store %arg16[%c16_39, %c0_40], %65 {strides = array<i32>} : memref<24x76xf32, #tpu.memory_space<vmem>>, vector<8x34xf32>,
    %67 = vector.extract_strided_slice %54 {offsets = [0, 34], sizes = [8, 34], strides = [1, 1]} : vector<8x68xf32> to vector<8x34xf32>
    %c16_41 = arith.constant 16 : index
    %c38 = arith.constant 38 : index
    %68 = vector.load %arg16[%c16_41, %c38] : memref<24x76xf32, #tpu.memory_space<vmem>>, vector<8x34xf32>
    tpu.vector_store %arg16[%c16_41, %c38], %67 {strides = array<i32>} : memref<24x76xf32, #tpu.memory_space<vmem>>, vector<8x34xf32>,
    %c0_42 = arith.constant 0 : index
    %c0_43 = arith.constant 0 : index
    %69 = vector.load %arg16[%c0_42, %c0_43] : memref<24x76xf32, #tpu.memory_space<vmem>>, vector<24x76xf32>
    %c0_44 = arith.constant 0 : index
    %c0_45 = arith.constant 0 : index
    %70 = vector.load %arg8[%c0_44, %c0_45] : memref<8x24xf32, #tpu.memory_space<vmem>>, vector<8x24xf32>
    %cst_46 = arith.constant dense<0.000000e+00> : vector<8x76xf32>
    %71 = tpu.matmul %70, %69, %cst_46 {dimension_numbers = #tpu.dot_dimension_numbers<[1], [0], [0], [1], [0, 0, 1, 1], [], []>} : vector<8x24xf32>, vector<24x76xf32>, vector<8x76xf32> -> vector<8x76xf32>
    %c0_47 = arith.constant 0 : index
    %c0_48 = arith.constant 0 : index
    %72 = vector.load %arg9[%c0_47, %c0_48] : memref<8x1xf32, #tpu.memory_space<vmem>>, vector<8x1xf32>
    %73 = vector.broadcast %72 : vector<8x1xf32> to vector<8x76xf32>
    %74 = arith.addf %71, %73 : vector<8x76xf32>
    %cst_49 = arith.constant dense<0.000000e+00> : vector<8xf32>
    %75 = vector.multi_reduction <add>, %74, %cst_49 [1] : vector<8x76xf32> to vector<8xf32>
    %76 = vector.shape_cast %75 : vector<8xf32> to vector<8x1xf32>
    %77 = arith.mulf %74, %74 : vector<8x76xf32>
    %cst_50 = arith.constant dense<0.000000e+00> : vector<8xf32>
    %78 = vector.multi_reduction <add>, %77, %cst_50 [1] : vector<8x76xf32> to vector<8xf32>
    %79 = vector.shape_cast %78 : vector<8xf32> to vector<8x1xf32>
    %cst_51 = arith.constant 0.0131578948 : f32
    %80 = vector.broadcast %cst_51 : f32 to vector<8x1xf32>
    %81 = arith.mulf %76, %80 : vector<8x1xf32>
    %cst_52 = arith.constant 0.0131578948 : f32
    %82 = vector.broadcast %cst_52 : f32 to vector<8x1xf32>
    %83 = arith.mulf %79, %82 : vector<8x1xf32>
    %84 = arith.mulf %81, %81 : vector<8x1xf32>
    %85 = arith.subf %83, %84 : vector<8x1xf32>
    %c0_53 = arith.constant 0 : index
    %c0_54 = arith.constant 0 : index
    %86 = vector.load %arg10[%c0_53, %c0_54] : memref<8x1xf32, #tpu.memory_space<vmem>>, vector<8x1xf32>
    %cst_55 = arith.constant 9.99999974E-6 : f32
    %87 = vector.broadcast %cst_55 : f32 to vector<8x1xf32>
    %88 = arith.addf %85, %87 : vector<8x1xf32>
    %89 = math.rsqrt %88 : vector<8x1xf32>
    %90 = arith.mulf %86, %89 : vector<8x1xf32>
    %91 = vector.broadcast %81 : vector<8x1xf32> to vector<8x76xf32>
    %92 = arith.subf %74, %91 : vector<8x76xf32>
    %93 = vector.broadcast %90 : vector<8x1xf32> to vector<8x76xf32>
    %94 = arith.mulf %92, %93 : vector<8x76xf32>
    %c0_56 = arith.constant 0 : index
    %c0_57 = arith.constant 0 : index
    %95 = vector.load %arg11[%c0_56, %c0_57] : memref<8x1xf32, #tpu.memory_space<vmem>>, vector<8x1xf32>
    %96 = vector.broadcast %95 : vector<8x1xf32> to vector<8x76xf32>
    %97 = arith.addf %94, %96 : vector<8x76xf32>
    %c0_58 = arith.constant 0 : index
    %98 = memref.load %arg12[%c0_58] : memref<1xf32, #tpu.memory_space<smem>>
    %cst_59 = arith.constant 0.000000e+00 : f32
    %99 = vector.broadcast %cst_59 : f32 to vector<8x76xf32>
    %100 = arith.cmpf oge, %97, %99 : vector<8x76xf32>
    %101 = vector.broadcast %98 : f32 to vector<8x76xf32>
    %102 = arith.mulf %101, %97 : vector<8x76xf32>
    %103 = arith.select %100, %97, %102 : vector<8x76xi1>, vector<8x76xf32>
    %c0_60 = arith.constant 0 : index
    %c0_61 = arith.constant 0 : index
    %104 = vector.load %arg13[%c0_60, %c0_61] : memref<8x8xf32, #tpu.memory_space<vmem>>, vector<8x8xf32>
    %cst_62 = arith.constant dense<0.000000e+00> : vector<8x76xf32>
    %105 = tpu.matmul %104, %103, %cst_62 {dimension_numbers = #tpu.dot_dimension_numbers<[1], [0], [0], [1], [0, 0, 1, 1], [], []>} : vector<8x8xf32>, vector<8x76xf32>, vector<8x76xf32> -> vector<8x76xf32>
    %c0_63 = arith.constant 0 : index
    %c0_64 = arith.constant 0 : index
    %106 = vector.load %arg14[%c0_63, %c0_64] : memref<8x1xf32, #tpu.memory_space<vmem>>, vector<8x1xf32>
    %107 = vector.broadcast %106 : vector<8x1xf32> to vector<8x76xf32>
    %108 = arith.addf %105, %107 : vector<8x76xf32>
    %c0_65 = arith.constant 0 : index
    %c0_66 = arith.constant 0 : index
    %109 = vector.load %arg15[%c0_65, %c0_66] : memref<8x76xf32, #tpu.memory_space<vmem>>, vector<8x76xf32>
    tpu.vector_store %arg15[%c0_65, %c0_66], %108 {strides = array<i32>} : memref<8x76xf32, #tpu.memory_space<vmem>>, vector<8x76xf32>,
    return
  }
}

</mosaic_0001>

<bundles_post_ra>
// kernel: tcn_block_forward.1
= control target key start
LH: loop header
LB: loop body
LE: loop exit
PB: predicated region body
PF: predicated region fallthrough
CT: control target
= control target key end

     0   :  { %vm53_vm0 = vcmask 621568   ;;  %vm78_vm1 = vcmask 261120   ;;  %v571_v1 = vmov 0.0   ;;  %s572_s20 = smov 2   ;;  %s573_s21 = smov 3   ;;  %vm574_vm2 = vmmov 0   ;;  %s747_s0 = inlined_call_operand.vmem [shape: f32[8,64], index: 0, kind: input, shape index: {}]   ;;  %s748_s2 = inlined_call_operand.vmem [shape: f32[8,1], index: 2, kind: input, shape index: {}]   ;;  %s749_s1 = inlined_call_operand.vmem [shape: f32[8,24], index: 1, kind: input, shape index: {}]   ;;  %s750_s4 = inlined_call_operand.vmem [shape: f32[8,1], index: 4, kind: input, shape index: {}]   ;;  %s751_s3 = inlined_call_operand.vmem [shape: f32[8,1], index: 3, kind: input, shape index: {}]   ;;  %s752_s7 = inlined_call_operand.vmem [shape: f32[8,1], index: 7, kind: input, shape index: {}]   ;;  %s753_s5 = inlined_call_operand.<no memory space> [shape: f32[1], index: 5, kind: input, shape index: {}]   ;;  %s754_s6 = inlined_call_operand.vmem [shape: f32[8,8], index: 6, kind: input, shape index: {}]   ;;  %s755_s9 = inlined_call_operand.vmem [shape: f32[8,1], index: 9, kind: input, shape index: {}]   ;;  %s756_s8 = inlined_call_operand.vmem [shape: f32[8,24], index: 8, kind: input, shape index: {}]   ;;  %s757_s11 = inlined_call_operand.vmem [shape: f32[8,1], index: 11, kind: input, shape index: {}]   ;;  %s758_s10 = inlined_call_operand.vmem [shape: f32[8,1], index: 10, kind: input, shape index: {}]   ;;  %s759_s14 = inlined_call_operand.vmem [shape: f32[8,1], index: 14, kind: input, shape index: {}]   ;;  %s760_s12 = inlined_call_operand.<no memory space> [shape: f32[1], index: 12, kind: input, shape index: {}]   ;;  %s761_s13 = inlined_call_operand.vmem [shape: f32[8,8], index: 13, kind: input, shape index: {}]   ;;  %s762_s15 = inlined_call_operand.vmem [shape: f32[8,76], index: 15, kind: output, shape index: {}]  }
   0x1   :  { %v52_v0 = vld [vmem:[%s747_s0] sm:$0xff]  ;;  %54 = vst.msk [vmem:[#allocation2] sm:$0xff] %vm53_vm0, %v571_v1  ;;  %56 = vst.msk [vmem:[#allocation2 + $0x10] sm:$0xff] %vm53_vm0, %v571_v1  ;;  %528 = vmatprep.subr.mxu0 %v571_v1  ;;  %537 = vmatprep.subr.mxu1 %v571_v1  ;;  %s575_s0 = smov 1   ;;  %s576_s22 = smov 4   ;;  %v577_v2 = vmov 0   ;;  %v198_v35 = vstv %s753_s5 }
   0x2   :  { %55 = vst.msk [vmem:[#allocation2 + $0x8] sm:$0xff] %vm53_vm0, %v571_v1  ;;  %58 = vrot.lane.b32.xlu0 %v52_v0, %s572_s20  ;;  %73 = vrot.lane.b32.xlu1 %v52_v0, %s573_s21  ;;  %v86_v3 = vld [vmem:[%s748_s2] sm:$0xff]  ;;  %vm61_vm3 = vcmask 277520   ;;  %vm80_vm4 = vcmask 539920   ;;  %vm71_vm5 = vcmask 269320   ;;  %vm66_vm6 = vcmask 556320  }
   0x3   :  { %79 = vst.msk [vmem:[#allocation2 + $0x10] sm:$0xff] %vm78_vm1, %v52_v0  ;;  %534 = vmatprep.mubr.msk.f32.mxu0 %vm574_vm2, %v571_v1  ;;  %539 = vmatprep.mubr.msk.f32.mxu1 %vm574_vm2, %v571_v1  ;;  %vm76_vm7 = vcmask 548120   ;;  %v85_v11 = vld [vmem:[%s749_s1] sm:$0xff]  ;;  %vm92_vm8 = vcmask 195584   ;;  %vm166_vm9 = vcmask 556032   ;;  %vm208_vm11 = vcmask 64512  }
   0x4   :  { %565 = vset.pattern.permute.xlu0 %v577_v2  ;;  %566 = vset.pattern.permute.xlu1 %v577_v2  ;;  %v189_v19 = vld [vmem:[%s750_s4] sm:$0xff]  ;;  %vm306_vm12 = vcmask 277504   ;;  %s578_s5 = smov 8   ;;  %vm299_vm13 = vcmask 293904   ;;  %vm289_vm14 = vcmask 310304   ;;  %vm308_vm15 = vcmask 589104  }
   0x5   :  { %v178_v27 = vld [vmem:[%s751_s3] sm:$0xff]  ;;  %vm294_vm1 = vcmask 621904  }
   0x6   :  { %68 = vrot.lane.b32.xlu0 %v52_v0, %s575_s0  ;;  %63 = vrot.lane.b32.xlu1 %v52_v0, %s576_s22  ;;  %v202_v30 = vld [vmem:[%s752_s7] sm:$0xff] }
   0x7   :  { %v201_v38 = vld [vmem:[%s754_s6] sm:$0xff]  ;;  %s579_s6 = smov 6  }
   0x8   :  { %v314_v44 = vld [vmem:[%s755_s9] sm:$0xff] }
   0x9   :  { %v313_v51 = vld [vmem:[%s756_s8] sm:$0xff] }
   0xa   :  { %89 = vperm.xlu0 %565, %v86_v3   ;;  %v415_v60 = vld [vmem:[%s757_s11] sm:$0xff] }
  0x74   :  { %v59_v4 = vpop.permute.xlu0 %58  ;;  %v74_v5 = vpop.permute.xlu1 %73 }
  0x75   :  { %62 = vst.msk [vmem:[#allocation2] sm:$0xff] %vm61_vm3, %v59_v4 }
  0x76   :  { %81 = vst.msk [vmem:[#allocation2 + $0x10] sm:$0xff] %vm80_vm4, %v59_v4  ;;  %v404_v4 = vld [vmem:[%s758_s10] sm:$0xff] }
  0x78   :  { %v69_v6 = vpop.permute.xlu0 %68  ;;  %v64_v7 = vpop.permute.xlu1 %63 }
  0x79   :  { %72 = vst.msk [vmem:[#allocation2 + $0x8] sm:$0xff] %vm71_vm5, %v69_v6 }
  0x7a   :  { %67 = vst.msk [vmem:[#allocation2] sm:$0xff] %vm66_vm6, %v64_v7  ;;  %v428_v7 = vld [vmem:[%s759_s14] sm:$0xff] }
  0x7b   :  { %77 = vst.msk [vmem:[#allocation2 + $0x8] sm:$0xff] %vm76_vm7, %v74_v5 }
  0x7d   :  { %v84_v8 = vld [vmem:[#allocation2 + $0x10] sm:$0xff] }
  0x7e   :  { %529 = vmatpush3.msra.mxu0 %v84_v8  ;;  %284 = vst.msk [vmem:[#allocation2 + $0x10] sm:$0xff] %vm53_vm0, %v571_v1 }
  0x7f   :  { %530 = vmatprep.subr.mxu0 %v571_v1 }
  0x81   :  { %v82_v9 = vld [vmem:[#allocation2] sm:$0xff] }
  0x82   :  { %v83_v10 = vld [vmem:[#allocation2 + $0x8] sm:$0xff]  ;;  %282 = vst.msk [vmem:[#allocation2] sm:$0xff] %vm53_vm0, %v571_v1 }
  0x83   :  { %531 = vmatpush3.msra.mxu0 %v83_v10  ;;  %283 = vst.msk [vmem:[#allocation2 + $0x8] sm:$0xff] %vm53_vm0, %v571_v1 }
  0x84   :  { %532 = vmatprep.subr.mxu0 %v571_v1 }
  0x85   :  { %533 = vmatpush3.msra.mxu0 %v82_v9  ;;  %v90_v12 = vpop.permute.xlu0 %89 }
  0x86   :  { %535 = vmatmul.mubr.msk.f32.vlgmr.msra.gmra.mxu0 %vm92_vm8, %v85_v11  ;;  %551 = vmatprep.subr.mxu0 %v571_v1 }
  0x87   :  { %553 = vmatprep.mubr.msk.f32.mxu0 %vm574_vm2, %v571_v1 }
 0x146   :  { %v162_v13 = vpop.f32.mrf.mxu0 }
 0x147   :  { %v163_v14 = vadd.f32 %v162_v13, %v90_v12  ;;  %v424_v12 = vstv %s760_s12 }
 0x148   :  { %v536_v15 = vpop.f32.mrf.mxu0 }
 0x149   :  { %v167_v16 = vsel %vm166_vm9, %v163_v14, 0.0  ;;  %v170_v17 = vmul.f32 %v163_v14, %v163_v14  ;;  %v427_v15 = vld [vmem:[%s761_s13] sm:$0xff] }
 0x14a   :  { %168 = vadd.xlane.f32.xlu1 %v167_v16 }
 0x14b   :  { %v171_v18 = vsel %vm166_vm9, %v170_v17, 0.0 }
 0x14c   :  { %172 = vadd.xlane.f32.xlu0 %v171_v18 }
 0x162   :  { %192 = vperm.xlu0 %565, %v189_v19  }
 0x1d3   :  { %v169_v20 = vpop.xlane.xlu1 %168 }
 0x1d4   :  { %v174_v21 = vmul.f32 0.014705882, %v169_v20 }
 0x1d5   :  { %v173_v22 = vpop.xlane.xlu0 %172 }
 0x1d6   :  { %v176_v23 = vmul.f32 %v174_v21, %v174_v21  ;;  %v175_v24 = vmul.f32 0.014705882, %v173_v22  ;;  %v182_v31 = vsub.f32 %v163_v14, %v174_v21 }
 0x1d8   :  { %v177_v25 = vsub.f32 %v175_v24, %v176_v23 }
 0x1da   :  { %v179_v26 = vadd.f32 1e-05, %v177_v25 }
 0x1dc   :  { %567 = vrsqrt.f32 %v179_v26 }
 0x1dd   :  { %v193_v34 = vpop.permute.xlu0 %192 }
 0x1e9   :  { %v568_v28 = vpop.eup %567 }
 0x1ea   :  { %v181_v29 = vmul.f32 %v568_v28, %v178_v27 }
 0x1ec   :  { %185 = vperm.xlu1 %566, %v181_v29  }
 0x1f0   :  { %205 = vperm.xlu1 %566, %v202_v30  }
 0x267   :  { %v186_v32 = vpop.permute.xlu1 %185 }
 0x268   :  { %v188_v33 = vmul.f32 %v186_v32, %v182_v31 }
 0x26a   :  { %v195_v36 = vadd.f32 %v193_v34, %v188_v33 }
 0x26b   :  { %v206_v40 = vpop.permute.xlu1 %205 }
 0x26c   :  { %vm197_vm10 = vcmp.ge.f32.partialorder %v195_v36, 0.0  ;;  %v199_v37 = vmul.f32 %v198_v35, %v195_v36 }
 0x26e   :  { %v200_v39 = vsel %vm197_vm10, %v195_v36, %v199_v37 }
 0x26f   :  { %538 = vmatpush3.msra.mxu1 %v200_v39 }
 0x270   :  { %540 = vmatmul.mubr.msk.f32.vlgmr.msra.gmra.mxu1 %vm208_vm11, %v201_v38  ;;  %542 = vmatprep.subr.mxu1 %v571_v1 }
 0x271   :  { %548 = vmatprep.mubr.msk.f32.mxu1 %vm574_vm2, %v571_v1  ;;  %vm304_vm2 = vcmask 605504  }
 0x330   :  { %v278_v41 = vpop.f32.mrf.mxu1 }
 0x331   :  { %v279_v42 = vadd.f32 %v278_v41, %v206_v40 }
 0x332   :  { %v541_v43 = vpop.f32.mrf.mxu1 }
 0x333   :  { %296 = vrot.lane.b32.xlu0 %v279_v42, %s572_s20  ;;  %286 = vrot.lane.b32.xlu1 %v279_v42, %s576_s22  ;;  %307 = vst.msk [vmem:[#allocation2 + $0x10] sm:$0xff] %vm306_vm12, %v279_v42 }
 0x337   :  { %291 = vrot.lane.b32.xlu0 %v279_v42, %s578_s5  ;;  %301 = vrot.lane.b32.xlu1 %v279_v42, %s579_s6 }
 0x33b   :  { %317 = vperm.xlu1 %566, %v314_v44  }
 0x3a5   :  { %v297_v45 = vpop.permute.xlu0 %296  ;;  %v287_v46 = vpop.permute.xlu1 %286 }
 0x3a6   :  { %300 = vst.msk [vmem:[#allocation2 + $0x8] sm:$0xff] %vm299_vm13, %v297_v45 }
 0x3a7   :  { %290 = vst.msk [vmem:[#allocation2] sm:$0xff] %vm289_vm14, %v287_v46 }
 0x3a8   :  { %309 = vst.msk [vmem:[#allocation2 + $0x10] sm:$0xff] %vm308_vm15, %v287_v46 }
 0x3a9   :  { %v292_v47 = vpop.permute.xlu0 %291  ;;  %v302_v48 = vpop.permute.xlu1 %301 }
 0x3aa   :  { %295 = vst.msk [vmem:[#allocation2] sm:$0xff] %vm294_vm1, %v292_v47 }
 0x3ab   :  { %305 = vst.msk [vmem:[#allocation2 + $0x8] sm:$0xff] %vm304_vm2, %v302_v48 }
 0x3af   :  { %v312_v49 = vld [vmem:[#allocation2 + $0x10] sm:$0xff] }
 0x3b0   :  { %543 = vmatpush3.msra.mxu1 %v312_v49 }
 0x3b1   :  { %544 = vmatprep.subr.mxu1 %v571_v1  ;;  %v310_v52 = vld [vmem:[#allocation2] sm:$0xff] }
 0x3b2   :  { %v311_v50 = vld [vmem:[#allocation2 + $0x8] sm:$0xff] }
 0x3b3   :  { %545 = vmatpush3.msra.mxu1 %v311_v50 }
 0x3b4   :  { %546 = vmatprep.subr.mxu1 %v571_v1 }
 0x3b5   :  { %547 = vmatpush3.msra.mxu1 %v310_v52 }
 0x3b6   :  { %549 = vmatmul.mubr.msk.f32.vlgmr.msra.gmra.mxu1 %vm92_vm8, %v313_v51  ;;  %v318_v53 = vpop.permute.xlu1 %317 }
 0x476   :  { %v389_v54 = vpop.f32.mrf.mxu1 }
 0x477   :  { %v390_v55 = vadd.f32 %v389_v54, %v318_v53 }
 0x478   :  { %v550_v56 = vpop.f32.mrf.mxu1 }
 0x479   :  { %v393_v57 = vsel %vm53_vm0, %v390_v55, 0.0  ;;  %v396_v58 = vmul.f32 %v390_v55, %v390_v55 }
 0x47a   :  { %394 = vadd.xlane.f32.xlu0 %v393_v57 }
 0x47b   :  { %v397_v59 = vsel %vm53_vm0, %v396_v58, 0.0 }
 0x47c   :  { %398 = vadd.xlane.f32.xlu1 %v397_v59 }
 0x48d   :  { %418 = vperm.xlu1 %566, %v415_v60  }
 0x503   :  { %v395_v61 = vpop.xlane.xlu0 %394 }
 0x504   :  { %v400_v62 = vmul.f32 0.013157895, %v395_v61 }
 0x505   :  { %v399_v63 = vpop.xlane.xlu1 %398 }
 0x506   :  { %v402_v0 = vmul.f32 %v400_v62, %v400_v62  ;;  %v401_v1 = vmul.f32 0.013157895, %v399_v63  ;;  %v408_v8 = vsub.f32 %v390_v55, %v400_v62 }
 0x508   :  { %v403_v2 = vsub.f32 %v401_v1, %v402_v0 }
 0x509   :  { %v419_v11 = vpop.permute.xlu1 %418 }
 0x50a   :  { %v405_v3 = vadd.f32 1e-05, %v403_v2 }
 0x50c   :  { %569 = vrsqrt.f32 %v405_v3 }
 0x519   :  { %v570_v5 = vpop.eup %569 }
 0x51a   :  { %v407_v6 = vmul.f32 %v570_v5, %v404_v4 }
 0x51c   :  { %411 = vperm.xlu0 %565, %v407_v6  }
 0x520   :  { %431 = vperm.xlu0 %565, %v428_v7  }
 0x597   :  { %v412_v9 = vpop.permute.xlu0 %411 }
 0x598   :  { %v414_v10 = vmul.f32 %v412_v9, %v408_v8 }
 0x59a   :  { %v421_v13 = vadd.f32 %v419_v11, %v414_v10 }
 0x59b   :  { %v432_v17 = vpop.permute.xlu0 %431 }
 0x59c   :  { %v425_v14 = vmul.f32 %v424_v12, %v421_v13  ;;  %vm423_vm3 = vcmp.ge.f32.partialorder %v421_v13, 0.0 }
 0x59e   :  { %v426_v16 = vsel %vm423_vm3, %v421_v13, %v425_v14 }
 0x59f   :  { %552 = vmatpush3.msra.mxu0 %v426_v16 }
 0x5a0   :  { %554 = vmatmul.mubr.msk.f32.vlgmr.msra.gmra.mxu0 %vm208_vm11, %v427_v15 }
 0x660   :  { %v503_v18 = vpop.f32.mrf.mxu0 }
 0x661   :  { %v504_v19 = vadd.f32 %v503_v18, %v432_v17 }
 0x662   :  { %v555_v20 = vpop.f32.mrf.mxu0 }
 0x663   :  { %507 = vst.msk [vmem:[%s762_s15] sm:$0xff] %vm53_vm0, %v504_v19 }

</bundles_post_ra>
